<compile_context>
chip_gen: v7x
topology: tpu7x:2x2x1
jax: 0.10.0
libtpu: 0.0.40
codegen_flags: <defaults>
</compile_context>

<pallas_src>
import functools

import jax
import jax.numpy as jnp
from jax.experimental import pallas as pl
from jax.experimental.pallas import tpu as pltpu

OBS_DIM = 16          # synthetic obs_dim (env-dependent in the original code)
HIDDEN = 64
ACTION_DIM = 3
OUT_WIDTH = 128       # hidden(64) | mean(3) | logstd(3) | value(1) | pad(57)
TB_MAX = 2048         # batch-tile upper bound (VMEM use stays tiny on all gens)


def _round_up(n, m):
    return ((n + m - 1) // m) * m


def _cdiv(a, b):
    return (a + b - 1) // b


def _fused_actor_critic_kernel(x_ref, w1_ref, b1_ref, w2_ref, b2_ref,
                               wh_ref, bh_ref, o_ref):
    """Fused shared MLP + identity-augmented packed heads, all VMEM-resident.

    Matmul inputs are bf16 (MXU), accumulation is f32, bias/ReLU epilogue f32,
    final store bf16.
    """
    # Linear(obs_dim, 64) + ReLU   (x cast to bf16 in-kernel, VPU slack is free)
    h1 = jnp.dot(x_ref[...].astype(w1_ref.dtype), w1_ref[...],
                 preferred_element_type=jnp.float32)
    h1 = jnp.maximum(h1 + b1_ref[...], 0.0)
    # Linear(64, 64) + ReLU
    h2 = jnp.dot(h1.astype(w2_ref.dtype), w2_ref[...],
                 preferred_element_type=jnp.float32)
    h2 = jnp.maximum(h2 + b2_ref[...], 0.0)
    # [hidden | actor_mean | actor_logstd | critic | 0-pad] in one MXU pass
    # (identity columns pass h2 through exactly, up to the bf16 input rounding).
    out = jnp.dot(h2.astype(wh_ref.dtype), wh_ref[...],
                  preferred_element_type=jnp.float32) + bh_ref[...]
    # Single lane-dense [TB, 128] bf16 store.
    o_ref[...] = out.astype(o_ref.dtype)


@functools.partial(jax.jit, static_argnames=("tb_max",))
def actor_critic_fused(x, params, *, tb_max=TB_MAX):
    """Returns (hidden, actor_mean, actor_logstd, value) from one pallas_call.

    All four outputs are bf16 slices of the single packed kernel output.
    """
    w1, b1, w2, b2, wh, bh = params
    batch, obs_dim = x.shape

    # Balanced tiling: at least 2 (and an even number of) grid steps so both
    # v7x TensorCores get work, and padding is bounded to < 8 rows.
    nb = max(2, _cdiv(batch, tb_max))
    if nb % 2:
        nb += 1
    tb = _round_up(_cdiv(batch, nb), 8)
    padded = nb * tb

    if padded != batch:
        x = jnp.pad(x, ((0, padded - batch), (0, 0)))

    bf16 = jnp.bfloat16
    flops = 2 * padded * (obs_dim * HIDDEN + HIDDEN * HIDDEN + HIDDEN * OUT_WIDTH)
    bytes_accessed = (padded * obs_dim * 4            # x read (f32)
                      + padded * OUT_WIDTH * 2        # packed output write (bf16)
                      + (obs_dim * HIDDEN + HIDDEN * HIDDEN
                         + HIDDEN * OUT_WIDTH) * 2    # bf16 weights
                      + (2 * HIDDEN + OUT_WIDTH) * 4)  # f32 biases

    grid_spec = pltpu.PrefetchScalarGridSpec(
        num_scalar_prefetch=0,
        grid=(nb,),
        in_specs=[
            pl.BlockSpec((tb, obs_dim), lambda i: (i, 0)),          # x tile (f32)
            pl.BlockSpec((obs_dim, HIDDEN), lambda i: (0, 0)),      # W1 (resident)
            pl.BlockSpec((1, HIDDEN), lambda i: (0, 0)),            # b1
            pl.BlockSpec((HIDDEN, HIDDEN), lambda i: (0, 0)),       # W2
            pl.BlockSpec((1, HIDDEN), lambda i: (0, 0)),            # b2
            pl.BlockSpec((HIDDEN, OUT_WIDTH), lambda i: (0, 0)),    # [I | heads] W
            pl.BlockSpec((1, OUT_WIDTH), lambda i: (0, 0)),         # [0 | heads] b
        ],
        out_specs=pl.BlockSpec((tb, OUT_WIDTH), lambda i: (i, 0)),
    )

    out = pl.pallas_call(
        _fused_actor_critic_kernel,
        out_shape=jax.ShapeDtypeStruct((padded, OUT_WIDTH), bf16),
        grid_spec=grid_spec,
        compiler_params=pltpu.CompilerParams(
            dimension_semantics=("parallel",)),      # megacore sharding on v7x
        cost_estimate=pl.CostEstimate(flops=int(flops), transcendentals=0,
                                      bytes_accessed=int(bytes_accessed)),
    )(x,
      w1.astype(bf16), b1,
      w2.astype(bf16), b2,
      wh.astype(bf16), bh)

    out = out[:batch]
    hidden = out[:, :HIDDEN]
    actor_mean = out[:, HIDDEN:HIDDEN + ACTION_DIM]
    actor_logstd = out[:, HIDDEN + ACTION_DIM:HIDDEN + 2 * ACTION_DIM]
    value = out[:, HIDDEN + 2 * ACTION_DIM:HIDDEN + 2 * ACTION_DIM + 1]
    return hidden, actor_mean, actor_logstd, value


def actor_critic_forward(x, params, **kw):
    """Matches PyTorch ActorCritic.forward(x): the shared-layer output [B, 64]."""
    return actor_critic_fused(x, params, **kw)[0]


def init_params(key, obs_dim=OBS_DIM, hidden=HIDDEN, action_dim=ACTION_DIM):
    """PyTorch-style uniform(+/- 1/sqrt(fan_in)) init; weights stored [in, out]."""
    ks = jax.random.split(key, 10)

    def linear(kw, kb, fan_in, fan_out):
        bound = 1.0 / jnp.sqrt(fan_in)
        w = jax.random.uniform(kw, (fan_in, fan_out), jnp.float32, -bound, bound)
        b = jax.random.uniform(kb, (1, fan_out), jnp.float32, -bound, bound)
        return w, b

    w1, b1 = linear(ks[0], ks[1], obs_dim, hidden)
    w2, b2 = linear(ks[2], ks[3], hidden, hidden)
    wm, bm = linear(ks[4], ks[5], hidden, action_dim)   # actor_mean
    ws, bs = linear(ks[6], ks[7], hidden, action_dim)   # actor_logstd
    wc, bc = linear(ks[8], ks[9], hidden, 1)            # critic

    # Identity-augmented head block: [I_64 | Wm | Ws | Wc | 0] -> [hidden, 128].
    wh = jnp.zeros((hidden, OUT_WIDTH), jnp.float32)
    wh = wh.at[:, :hidden].set(jnp.eye(hidden, dtype=jnp.float32))
    wh = wh.at[:, hidden:hidden + action_dim].set(wm)
    wh = wh.at[:, hidden + action_dim:hidden + 2 * action_dim].set(ws)
    wh = wh.at[:, hidden + 2 * action_dim:hidden + 2 * action_dim + 1].set(wc)
    bh = jnp.zeros((1, OUT_WIDTH), jnp.float32)
    bh = bh.at[:, hidden:hidden + action_dim].set(bm)
    bh = bh.at[:, hidden + action_dim:hidden + 2 * action_dim].set(bs)
    bh = bh.at[:, hidden + 2 * action_dim:hidden + 2 * action_dim + 1].set(bc)
    # TODO(synk): act()/evaluate() distribution math (clamp, exp, Normal sample,
    # tanh squash, log_prob/entropy) stays in plain JAX on top of these outputs,
    # and a heads-only (transposed, lane-dense) rollout variant could cut HBM
    # writes a further ~4x for the act() path.
    return (w1, b1, w2, b2, wh, bh)


if __name__ == "__main__":
    key = jax.random.PRNGKey(0)
    k_params, k_x = jax.random.split(key)
    params = init_params(k_params)

    BATCH = 16
    x = jax.random.normal(k_x, (BATCH, OBS_DIM), jnp.float32)

    hidden, a_mean, a_logstd, value = jax.block_until_ready(
        actor_critic_fused(x, params))

    # Pure-JAX reference emulating the kernel's bf16-input / f32-accumulate math.
    def q(a):
        return a.astype(jnp.bfloat16).astype(jnp.float32)

    w1, b1, w2, b2, wh, bh = params
    h1_ref = jnp.maximum(q(x) @ q(w1) + b1, 0.0)
    h2_ref = jnp.maximum(q(h1_ref) @ q(w2) + b2, 0.0)
    out_ref = q(h2_ref) @ q(wh) + bh

    f32 = jnp.float32
    assert hidden.shape == (BATCH, HIDDEN)
    assert a_mean.shape == (BATCH, ACTION_DIM)
    assert a_logstd.shape == (BATCH, ACTION_DIM)
    assert value.shape == (BATCH, 1)
    assert jnp.allclose(hidden.astype(f32), out_ref[:, :HIDDEN],
                        atol=2e-2, rtol=2e-2)
    assert jnp.allclose(a_mean.astype(f32),
                        out_ref[:, HIDDEN:HIDDEN + ACTION_DIM],
                        atol=2e-2, rtol=2e-2)
    assert jnp.allclose(a_logstd.astype(f32),
                        out_ref[:, HIDDEN + ACTION_DIM:HIDDEN + 2 * ACTION_DIM],
                        atol=2e-2, rtol=2e-2)
    assert jnp.allclose(value.astype(f32),
                        out_ref[:, HIDDEN + 2 * ACTION_DIM:
                                HIDDEN + 2 * ACTION_DIM + 1],
                        atol=2e-2, rtol=2e-2)

    print("KERNEL_OK")
</pallas_src>

<mosaic_0001>
module attributes {stable_mosaic.version = 11 : i64} {
  func.func @_fused_actor_critic_kernel(%arg0: i32, %arg1: memref<8x16xf32, #tpu.memory_space<vmem>>, %arg2: memref<16x64xbf16, #tpu.memory_space<vmem>>, %arg3: memref<1x64xf32, #tpu.memory_space<vmem>>, %arg4: memref<64x64xbf16, #tpu.memory_space<vmem>>, %arg5: memref<1x64xf32, #tpu.memory_space<vmem>>, %arg6: memref<64x128xbf16, #tpu.memory_space<vmem>>, %arg7: memref<1x128xf32, #tpu.memory_space<vmem>>, %arg8: memref<8x128xbf16, #tpu.memory_space<vmem>>) attributes {dimension_semantics = [#tpu.dimension_semantics<parallel>], iteration_bounds = array<i64: 2>, scalar_prefetch = 0 : i64, scratch_operands = 0 : i64, tpu.core_type = #tpu.core_type<tc>, window_params = [{transform_indices = @transform_0, window_bounds = array<i64: 8, 16>}, {pipeline_mode = #tpu.pipeline_mode<synchronous>, transform_indices = @transform_1, window_bounds = array<i64: 16, 64>}, {pipeline_mode = #tpu.pipeline_mode<synchronous>, transform_indices = @transform_2, window_bounds = array<i64: 1, 64>}, {pipeline_mode = #tpu.pipeline_mode<synchronous>, transform_indices = @transform_3, window_bounds = array<i64: 64, 64>}, {pipeline_mode = #tpu.pipeline_mode<synchronous>, transform_indices = @transform_4, window_bounds = array<i64: 1, 64>}, {pipeline_mode = #tpu.pipeline_mode<synchronous>, transform_indices = @transform_5, window_bounds = array<i64: 64, 128>}, {pipeline_mode = #tpu.pipeline_mode<synchronous>, transform_indices = @transform_6, window_bounds = array<i64: 1, 128>}, {transform_indices = @transform_7, window_bounds = array<i64: 8, 128>}]} {
    %c0 = arith.constant 0 : index
    %c0_0 = arith.constant 0 : index
    %0 = vector.load %arg1[%c0, %c0_0] : memref<8x16xf32, #tpu.memory_space<vmem>>, vector<8x16xf32>
    %1 = arith.truncf %0 : vector<8x16xf32> to vector<8x16xbf16>
    %c0_1 = arith.constant 0 : index
    %c0_2 = arith.constant 0 : index
    %2 = vector.load %arg2[%c0_1, %c0_2] : memref<16x64xbf16, #tpu.memory_space<vmem>>, vector<16x64xbf16>
    %cst = arith.constant dense<0.000000e+00> : vector<8x64xf32>
    %3 = tpu.matmul %1, %2, %cst {dimension_numbers = #tpu.dot_dimension_numbers<[1], [0], [0], [1], [0, 0, 1, 1], [], []>} : vector<8x16xbf16>, vector<16x64xbf16>, vector<8x64xf32> -> vector<8x64xf32>
    %c0_3 = arith.constant 0 : index
    %c0_4 = arith.constant 0 : index
    %4 = vector.load %arg3[%c0_3, %c0_4] : memref<1x64xf32, #tpu.memory_space<vmem>>, vector<1x64xf32>
    %5 = vector.broadcast %4 : vector<1x64xf32> to vector<8x64xf32>
    %6 = arith.addf %3, %5 : vector<8x64xf32>
    %cst_5 = arith.constant 0.000000e+00 : f32
    %7 = vector.broadcast %cst_5 : f32 to vector<8x64xf32>
    %8 = arith.maximumf %6, %7 : vector<8x64xf32>
    %9 = arith.truncf %8 : vector<8x64xf32> to vector<8x64xbf16>
    %c0_6 = arith.constant 0 : index
    %c0_7 = arith.constant 0 : index
    %10 = vector.load %arg4[%c0_6, %c0_7] : memref<64x64xbf16, #tpu.memory_space<vmem>>, vector<64x64xbf16>
    %cst_8 = arith.constant dense<0.000000e+00> : vector<8x64xf32>
    %11 = tpu.matmul %9, %10, %cst_8 {dimension_numbers = #tpu.dot_dimension_numbers<[1], [0], [0], [1], [0, 0, 1, 1], [], []>} : vector<8x64xbf16>, vector<64x64xbf16>, vector<8x64xf32> -> vector<8x64xf32>
    %c0_9 = arith.constant 0 : index
    %c0_10 = arith.constant 0 : index
    %12 = vector.load %arg5[%c0_9, %c0_10] : memref<1x64xf32, #tpu.memory_space<vmem>>, vector<1x64xf32>
    %13 = vector.broadcast %12 : vector<1x64xf32> to vector<8x64xf32>
    %14 = arith.addf %11, %13 : vector<8x64xf32>
    %cst_11 = arith.constant 0.000000e+00 : f32
    %15 = vector.broadcast %cst_11 : f32 to vector<8x64xf32>
    %16 = arith.maximumf %14, %15 : vector<8x64xf32>
    %17 = arith.truncf %16 : vector<8x64xf32> to vector<8x64xbf16>
    %c0_12 = arith.constant 0 : index
    %c0_13 = arith.constant 0 : index
    %18 = vector.load %arg6[%c0_12, %c0_13] : memref<64x128xbf16, #tpu.memory_space<vmem>>, vector<64x128xbf16>
    %cst_14 = arith.constant dense<0.000000e+00> : vector<8x128xf32>
    %19 = tpu.matmul %17, %18, %cst_14 {dimension_numbers = #tpu.dot_dimension_numbers<[1], [0], [0], [1], [0, 0, 1, 1], [], []>} : vector<8x64xbf16>, vector<64x128xbf16>, vector<8x128xf32> -> vector<8x128xf32>
    %c0_15 = arith.constant 0 : index
    %c0_16 = arith.constant 0 : index
    %20 = vector.load %arg7[%c0_15, %c0_16] : memref<1x128xf32, #tpu.memory_space<vmem>>, vector<1x128xf32>
    %21 = vector.broadcast %20 : vector<1x128xf32> to vector<8x128xf32>
    %22 = arith.addf %19, %21 : vector<8x128xf32>
    %23 = arith.truncf %22 : vector<8x128xf32> to vector<8x128xbf16>
    %c0_17 = arith.constant 0 : index
    %c0_18 = arith.constant 0 : index
    %24 = vector.load %arg8[%c0_17, %c0_18] : memref<8x128xbf16, #tpu.memory_space<vmem>>, vector<8x128xbf16>
    tpu.vector_store %arg8[%c0_17, %c0_18], %23 {strides = array<i32>} : memref<8x128xbf16, #tpu.memory_space<vmem>>, vector<8x128xbf16>,
    return
  }
  func.func @transform_0(%arg0: i32) -> (i32, i32) {
    %c0_i32 = arith.constant 0 : i32
    %c0_i32_0 = arith.constant 0 : i32
    return %arg0, %c0_i32 : i32, i32
  }
  func.func @transform_1(%arg0: i32) -> (i32, i32) {
    %c0_i32 = arith.constant 0 : i32
    %c0_i32_0 = arith.constant 0 : i32
    %c0_i32_1 = arith.constant 0 : i32
    return %c0_i32, %c0_i32_0 : i32, i32
  }
  func.func @transform_2(%arg0: i32) -> (i32, i32) {
    %c0_i32 = arith.constant 0 : i32
    %c0_i32_0 = arith.constant 0 : i32
    %c0_i32_1 = arith.constant 0 : i32
    return %c0_i32, %c0_i32_0 : i32, i32
  }
  func.func @transform_3(%arg0: i32) -> (i32, i32) {
    %c0_i32 = arith.constant 0 : i32
    %c0_i32_0 = arith.constant 0 : i32
    %c0_i32_1 = arith.constant 0 : i32
    return %c0_i32, %c0_i32_0 : i32, i32
  }
  func.func @transform_4(%arg0: i32) -> (i32, i32) {
    %c0_i32 = arith.constant 0 : i32
    %c0_i32_0 = arith.constant 0 : i32
    %c0_i32_1 = arith.constant 0 : i32
    return %c0_i32, %c0_i32_0 : i32, i32
  }
  func.func @transform_5(%arg0: i32) -> (i32, i32) {
    %c0_i32 = arith.constant 0 : i32
    %c0_i32_0 = arith.constant 0 : i32
    %c0_i32_1 = arith.constant 0 : i32
    return %c0_i32, %c0_i32_0 : i32, i32
  }
  func.func @transform_6(%arg0: i32) -> (i32, i32) {
    %c0_i32 = arith.constant 0 : i32
    %c0_i32_0 = arith.constant 0 : i32
    %c0_i32_1 = arith.constant 0 : i32
    return %c0_i32, %c0_i32_0 : i32, i32
  }
  func.func @transform_7(%arg0: i32) -> (i32, i32) {
    %c0_i32 = arith.constant 0 : i32
    %c0_i32_0 = arith.constant 0 : i32
    return %arg0, %c0_i32 : i32, i32
  }
}

</mosaic_0001>

<bundles_post_ra>
// kernel: actor_critic_fused.1
= control target key start
LH: loop header
LB: loop body
LE: loop exit
PB: predicated region body
PF: predicated region fallthrough
CT: control target
= control target key end

     0   :  { %s695_s24 = smov 0   ;;  %s757_s0 = inlined_call_operand.vmem [shape: f32[16,16], index: 0, kind: input, shape index: {}]   ;;  %s758_s1 = inlined_call_operand.vmem [shape: bf16[16,64], index: 1, kind: input, shape index: {}]   ;;  %s759_s2 = inlined_call_operand.vmem [shape: f32[1,64], index: 2, kind: input, shape index: {}]   ;;  %s760_s3 = inlined_call_operand.vmem [shape: bf16[64,64], index: 3, kind: input, shape index: {}]   ;;  %s761_s4 = inlined_call_operand.vmem [shape: f32[1,64], index: 4, kind: input, shape index: {}]   ;;  %s762_s5 = inlined_call_operand.vmem [shape: bf16[64,128], index: 5, kind: input, shape index: {}]   ;;  %s763_s6 = inlined_call_operand.vmem [shape: f32[1,128], index: 6, kind: input, shape index: {}]   ;;  %s764_s7 = inlined_call_operand.vmem [shape: bf16[16,128], index: 7, kind: output, shape index: {}]  }
   0x1 LB: > { %s560_s25 = sadd.s32 4294967295, %s651_s24   ;;  %p564_p0 = scmp.ge.s32.totalorder %s651_s24, 1  ;;  %s651_s24 = sphi %s695_s24, %s17_s24  }
   0x2   : > { %p236_p1 = scmp.lt.s32.totalorder %s651_s24, 3 }
   0x4   : > { %p237_p2 = pnand %p564_p0, %p236_p1 }
   0x5   : > { %v636_v0 = vld [vmem:[%s758_s1] sm:$0xff] (!%p237_p2)   ;;  %v653_v1 = vmov (!%p237_p2), 0.0   ;;  %p266_p3 = scmp.lt.s32.totalorder (!%p237_p2), %s560_s25, 1  ;;  %vm654_vm0 = vmmov (!%p237_p2), 0   ;;  %v638_v3 = vld [vmem:[%s760_s3 + $0x8] sm:$0xff] (!%p237_p2)   ;;  %vm292_vm1 = vcmask (!%p237_p2), 130048  }
   0x6   : > { %240 = sbr.rel (%p237_p2) target bundleno = 672 (0x2a0), region = 48  ;;  %596 = vmatprep.subr.bf16.mxu0 (!%p237_p2), %v653_v1  ;;  %602 = vmatprep.subr.bf16.mxu1 (!%p237_p2), %v653_v1  ;;  %v637_v2 = vld [vmem:[%s760_s3] sm:$0xff] (!%p237_p2)   ;;  %v639_v6 = vld [vmem:[%s760_s3 + $0x10] sm:$0xff] (!%p237_p2)   ;;  %v640_v7 = vld [vmem:[%s760_s3 + $0x18] sm:$0xff] (!%p237_p2)   ;;  %vm377_vm2 = vcmask (!%p237_p2), 523264  }
   0x7   : > { %597 = vmatpush3.bf16.msra.mxu0 (!%p237_p2), %v636_v0  ;;  %598 = vmatprep.mubr.msk.bf16.mxu0 (!%p237_p2), %vm654_vm0, %v653_v1  ;;  %v641_v8 = vld [vmem:[%s762_s5] sm:$0xff] (!%p237_p2)   ;;  %v642_v9 = vld [vmem:[%s762_s5 + $0x8] sm:$0xff] (!%p237_p2)   ;;  %v643_v18 = vld [vmem:[%s762_s5 + $0x10] sm:$0xff] (!%p237_p2)  }
   0x8   : > { %603 = vmatpush3.bf16.msra.mxu1 (!%p237_p2), %v637_v2  ;;  %610 = vmatprep.mubr.msk.bf16.mxu1 (!%p237_p2), %vm654_vm0, %v653_v1  ;;  %v567_v10 = vld [vmem:[%s759_s2] ss:$0 sm:$0xff] (!%p237_p2)  ;;  %v644_v19 = vld [vmem:[%s762_s5 + $0x18] sm:$0xff] (!%p237_p2)  }
   0x9   : > { %604 = vmatprep.subr.bf16.mxu1 (!%p237_p2), %v653_v1  ;;  %614 = vmatprep.subr.bf16.mxu0 (!%p237_p2), %v653_v1  ;;  %v570_v20 = vld [vmem:[%s761_s4] ss:$0 sm:$0xff] (!%p237_p2) }
   0xa   : > { %v576_v28 = vld [vmem:[%s763_s6] ss:$0 sm:$0xff] (!%p237_p2) }
   0xc   : > { %605 = vmatpush3.bf16.msra.mxu1 (!%p237_p2), %v638_v3 }
   0xd   : > { %s766_s25 = smov (!%p266_p3, %s560_s25), 1  ;;  %606 = vmatprep.subr.bf16.mxu1 %v653_v1 }
   0xe   : > { %s565_s9 = sshll.u32 %s766_s25, 3  ;;  %s566_s10 = sshll.u32 %s766_s25, 2 }
   0xf   : > { %s269_s12 = scalar_lea.vmem %s757_s0, %s565_s9  ;;  %s273_s13 = scalar_lea.vmem %s764_s7, %s566_s10 }
  0x10   : > { %v275_v4 = vld [vmem:[%s269_s12] sm:$0xff]  ;;  %607 = vmatpush3.bf16.msra.mxu1 %v639_v6 }
  0x11   : > { %v276_v5 = vpack.c.bf16 %v275_v4, %v275_v4  ;;  %608 = vmatprep.subr.bf16.mxu1 %v653_v1 }
  0x13   : > { %599 = vmatmul.mubr.msk.bf16.vlgmr.msra.gmra.mrb[0].mxu0 %vm292_vm1, %v276_v5 }
  0x14   : > { %622 = vmatprep.mubr.msk.bf16.mxu0 %vm654_vm0, %v653_v1  ;;  %609 = vmatpush3.bf16.msra.mxu1 %v640_v7 }
  0x15   : > { %615 = vmatpush3.bf16.msra.mxu0 %v641_v8 }
  0x16   : > { %616 = vmatprep.subr.bf16.mxu0 %v653_v1 }
  0x19   : > { %617 = vmatpush3.bf16.msra.mxu0 %v642_v9 }
  0x1a   : > { %618 = vmatprep.subr.bf16.mxu0 %v653_v1 }
  0x1d   : > { %619 = vmatpush3.bf16.msra.mxu0 %v643_v18 }
  0x1e   : > { %620 = vmatprep.subr.bf16.mxu0 %v653_v1 }
  0x21   : > { %621 = vmatpush3.bf16.msra.mxu0 %v644_v19 }
  0xe6   : > { %v330_v11 = vpop.f32.mrb[0].mxu0 }
  0xe7   : > { %v331_v12 = vadd.f32 %v567_v10, %v330_v11  ;;  %v600_v13 = vpop.f32.mrb[1].mxu0 }
  0xe8   : > { %v333_v14 = vpop.f32.mrb[2].mxu0 }
  0xe9   : > { %v336_v15 = vmax.f32 %v331_v12, 0.0  ;;  %v601_v16 = vpop.f32.mrb[3].mxu0 }
  0xeb   : > { %v337_v17 = vpack.c.bf16 %v336_v15, %v336_v15 }
  0xed   : > { %611 = vmatmul.mubr.msk.bf16.vlgmr.msra.gmra.mrb[0].mxu1 %vm377_vm2, %v337_v17 }
 0x1c0   : > { %v415_v21 = vpop.f32.mrb[0].mxu1 }
 0x1c1   : > { %v416_v22 = vadd.f32 %v570_v20, %v415_v21  ;;  %v612_v23 = vpop.f32.mrb[1].mxu1 }
 0x1c2   : > { %v418_v24 = vpop.f32.mrb[2].mxu1 }
 0x1c3   : > { %v421_v25 = vmax.f32 %v416_v22, 0.0  ;;  %v613_v26 = vpop.f32.mrb[3].mxu1 }
 0x1c5   : > { %v422_v27 = vpack.c.bf16 %v421_v25, %v421_v25 }
 0x1c7   : > { %623 = vmatmul.mubr.msk.bf16.vlgmr.msra.gmra.mrb[4].mxu0 %vm377_vm2, %v422_v27 }
 0x29a   : > { %v499_v29 = vpop.f32.mrb[4].mxu0 }
 0x29b   : > { %v500_v30 = vadd.f32 %v576_v28, %v499_v29  ;;  %v624_v31 = vpop.f32.mrb[5].mxu0 }
 0x29c   : > { %v502_v32 = vpop.f32.mrb[6].mxu0 }
 0x29d   : > { %v505_v33 = vpack.c.bf16 %v500_v30, %v500_v30  ;;  %v625_v34 = vpop.f32.mrb[7].mxu0 }
 0x29f   : > { %506 = vst [vmem:[%s273_s13] sm:$0xf] %v505_v33 }
 0x2a0 PF: > { %s17_s24 = sadd.s32 1, %s651_s24  }
 0x2a1   : > { %p14_p4 = scmp.ge.s32.totalorder %s17_s24, 4  }
 0x2a3   :  { %16 = sbr.rel (!%p14_p4) target bundleno = 1 (0x1), region = 78 }

</bundles_post_ra>
